<compile_context>
chip_gen: v7x
topology: tpu7x:2x2x1
jax: 0.10.0
libtpu: 0.0.40
codegen_flags: <defaults>
</compile_context>

<pallas_src>
import math
import functools

import jax
import jax.numpy as jnp
import numpy as np
from jax import lax
from jax.experimental import pallas as pl
from jax.experimental.pallas import tpu as pltpu


def encoder_kernel(emb_ref, pe_ref,
                   wqkv_ref, bqkv_ref, wo_ref, bo_ref,
                   w1_ref, b1_ref, w2_ref, b2_ref,
                   ln1a_ref, ln1b_ref, ln2a_ref, ln2b_ref,
                   out_ref, acc_ref, *, h, dk, eps):
    bb, S, D = emb_ref.shape
    rows = bb * S
    cd = wqkv_ref.dtype                       # MXU input dtype (f32 or bf16)
    sqrt_d = jnp.float32(math.sqrt(D))
    inv_sqrt_dk = jnp.float32(1.0 / math.sqrt(dk))

    # --- InputEmbeddings scale + positional encoding (dropout == identity) ---
    x = emb_ref[...] * sqrt_d + pe_ref[...]                  # (bb, S, D) f32
    x2 = x.reshape(rows, D)                                  # row slab for wide matmuls
    xc = x2.astype(cd)

    # --- fused QKV projection: single (rows, D) @ (D, 3D) MXU pass ---
    qkv = jnp.dot(xc, wqkv_ref[...],
                  preferred_element_type=jnp.float32) + bqkv_ref[...]
    q = qkv[:, 0 * D:1 * D].reshape(bb, S, D).astype(cd)
    k = qkv[:, 1 * D:2 * D].reshape(bb, S, D).astype(cd)
    v = qkv[:, 2 * D:3 * D].reshape(bb, S, D).astype(cd)

    # --- multi-head attention (mask is None in this Encoder -> no masking) ---
    # Each head's (ctx @ Wo[head]) is accumulated into a f32 VMEM scratch, so
    # there is no lane-axis concat and live ranges stay bounded per head.
    # Heads use static lane slices (dk is small / not 128-aligned, so dynamic
    # lane-offset slicing would be costly); h is small, so the unroll is cheap.
    wo_full = wo_ref[...]                                    # (D, D) compute dtype
    acc_ref[...] = jnp.zeros_like(acc_ref)
    for i in range(h):
        sl = slice(i * dk, (i + 1) * dk)
        qh, kh, vh = q[:, :, sl], k[:, :, sl], v[:, :, sl]   # (bb, S, dk)
        # scores: contract last dims directly (no kh.T materialization)
        sc = lax.dot_general(qh, kh, (((2,), (2,)), ((0,), (0,))),
                             preferred_element_type=jnp.float32) * inv_sqrt_dk
        sc = sc - jnp.max(sc, axis=-1, keepdims=True)
        p = jnp.exp(sc)
        p = p * pl.reciprocal(jnp.sum(p, axis=-1, keepdims=True), approx=True)
        ctx = lax.dot_general(p.astype(cd), vh, (((2,), (1,)), ((0,), (0,))),
                              preferred_element_type=jnp.float32)   # (bb, S, dk)
        acc_ref[...] += jnp.dot(ctx.reshape(rows, dk).astype(cd), wo_full[sl, :],
                                preferred_element_type=jnp.float32)
    mha = acc_ref[...] + bo_ref[...]                         # (rows, D) f32
    # TODO(synk): for long sequences, stream KV with online-softmax (flash)
    # tiling instead of materializing the full (S, S) score block.

    # --- residual + LayerNorm 1 (torch.std semantics: unbiased, ddof=1) ---
    h1 = x2 + mha
    mu1 = jnp.mean(h1, axis=-1, keepdims=True)
    cen1 = h1 - mu1
    var1 = jnp.sum(cen1 * cen1, axis=-1, keepdims=True) / jnp.float32(D - 1)
    n1 = ln1a_ref[0, 0] * cen1 * lax.rsqrt(var1 + eps) + ln1b_ref[0, 0]

    # --- FeedForward ---
    f = jnp.dot(n1.astype(cd), w1_ref[...],
                preferred_element_type=jnp.float32) + b1_ref[...]
    f = jnp.maximum(f, 0.0)
    ff = jnp.dot(f.astype(cd), w2_ref[...],
                 preferred_element_type=jnp.float32) + b2_ref[...]

    # --- residual + LayerNorm 2 ---
    h2 = ff + n1
    mu2 = jnp.mean(h2, axis=-1, keepdims=True)
    cen2 = h2 - mu2
    var2 = jnp.sum(cen2 * cen2, axis=-1, keepdims=True) / jnp.float32(D - 1)
    out = ln2a_ref[0, 0] * cen2 * lax.rsqrt(var2 + eps) + ln2b_ref[0, 0]
    # TODO(synk): for D not a multiple of 128 this is a masked (lane-sparse)
    # store; padding D at the model boundary would make it a dense vst.
    out_ref[...] = out.reshape(bb, S, D).astype(out_ref.dtype)


def encoder_forward(tokens, params, *, h, eps=1e-6,
                    compute_dtype=jnp.float32, row_target=256):
    """tokens: int32 [B, S].  Returns float32 [B, S, D]."""
    emb_table = params["emb"]
    D = emb_table.shape[1]
    B, S = tokens.shape
    dk = D // h
    U = params["w1"].shape[1]
    cd = compute_dtype

    # Embedding lookup (gather) stays in plain JAX glue.
    embedded = jnp.take(emb_table, tokens, axis=0)           # (B, S, D) f32
    pe = params["pe"][:S]                                    # (S, D)

    # Fused QKV weight (one wide-N matmul in the kernel).  Matmul weights are
    # cast to the compute dtype once here; biases stay f32 (added to f32 acc).
    wqkv = jnp.concatenate([params["wq"], params["wk"], params["wv"]],
                           axis=1).astype(cd)                # (D, 3D)
    bqkv = jnp.concatenate([params["bq"], params["bk"], params["bv"]], axis=1)
    wo = params["wo"].astype(cd)
    w1 = params["w1"].astype(cd)
    w2 = params["w2"].astype(cd)
    bo, b1, b2 = params["bo"], params["b1"], params["b2"]

    # Batch elements per grid step: give the MXU a tall row slab, but keep at
    # least 2 grid steps (when B allows) so both v7x TensorCores get work.
    bb = 1
    for cand in range(1, B + 1):
        if B % cand != 0:
            continue
        if cand * S > max(row_target, S):
            continue
        if (B // cand) < min(2, B):
            continue
        bb = cand
    grid = (B // bb,)

    weights = [wqkv, bqkv, wo, bo, w1, b1, w2, b2]
    scalars = [params[k] for k in ("ln1_a", "ln1_b", "ln2_a", "ln2_b")]

    def full_vmem(a):
        # Constant index_map: the same block is reused by every grid step.
        # NOTE: on JAX versions where pl.Buffered(1) is accepted for the main
        # pipeline, pipeline_mode=pl.Buffered(1) here would halve the resident
        # weight footprint (their index_map never changes).
        return pl.BlockSpec(a.shape, lambda b: (0,) * a.ndim)

    def scalar_smem(a):
        return pl.BlockSpec(a.shape, lambda b: (0, 0),
                            memory_space=pltpu.MemorySpace.SMEM)

    kernel = functools.partial(encoder_kernel, h=h, dk=dk, eps=eps)

    # Explicit VMEM budget: weights + double-buffered activation blocks +
    # in-kernel temporaries, with generous slack; clamped for v7x (64 MiB).
    def nbytes(a):
        return int(a.size) * a.dtype.itemsize
    act_bytes = bb * S * D * 4
    vmem_budget = (sum(nbytes(w) for w in weights)
                   + 2 * 2 * act_bytes                       # in/out double buffers
                   + bb * S * max(3 * D, U) * 4 * 8          # temporaries (qkv, scores, ffn)
                   + (1 << 20))
    vmem_budget = int(min(max(vmem_budget, 16 * 1024 * 1024), 48 * 1024 * 1024))
    # TODO(synk): for D >~ 768 with units=4D in f32 on v7x, tile the FFN
    # 'units' dimension (extra grid axis) instead of keeping w1/w2 resident.

    out = pl.pallas_call(
        kernel,
        out_shape=jax.ShapeDtypeStruct((B, S, D), jnp.float32),
        grid_spec=pltpu.PrefetchScalarGridSpec(
            num_scalar_prefetch=0,
            grid=grid,
            in_specs=[pl.BlockSpec((bb, S, D), lambda b: (b, 0, 0)),
                      full_vmem(pe)]
                     + [full_vmem(w) for w in weights]
                     + [scalar_smem(s) for s in scalars],
            out_specs=pl.BlockSpec((bb, S, D), lambda b: (b, 0, 0)),
            scratch_shapes=[pltpu.VMEM((bb * S, D), jnp.float32)],
        ),
        compiler_params=pltpu.CompilerParams(
            dimension_semantics=("parallel",),
            vmem_limit_bytes=vmem_budget),
    )(embedded, pe, *weights, *scalars)
    return out


def init_params(key, dim_model, h, vocab_size, seq_len, units):
    ks = jax.random.split(key, 8)

    def linear(k, fan_in, fan_out):
        bound = 1.0 / math.sqrt(fan_in)
        kw, kb = jax.random.split(k)
        w = jax.random.uniform(kw, (fan_in, fan_out), jnp.float32, -bound, bound)
        b = jax.random.uniform(kb, (1, fan_out), jnp.float32, -bound, bound)
        return w, b

    wq, bq = linear(ks[1], dim_model, dim_model)
    wk, bk = linear(ks[2], dim_model, dim_model)
    wv, bv = linear(ks[3], dim_model, dim_model)
    wo, bo = linear(ks[4], dim_model, dim_model)
    w1, b1 = linear(ks[5], dim_model, units)
    w2, b2 = linear(ks[6], units, dim_model)

    emb = jax.random.normal(ks[0], (vocab_size, dim_model), jnp.float32)

    pos = jnp.arange(seq_len, dtype=jnp.float32)[:, None]
    denom = jnp.exp(jnp.arange(0, dim_model, 2, dtype=jnp.float32)
                    * (-math.log(10000.0) / dim_model))
    pe = jnp.zeros((seq_len, dim_model), jnp.float32)
    pe = pe.at[:, 0::2].set(jnp.sin(pos * denom))
    pe = pe.at[:, 1::2].set(jnp.cos(pos * denom))

    one = jnp.ones((1, 1), jnp.float32)
    zero = jnp.zeros((1, 1), jnp.float32)
    return dict(emb=emb, pe=pe,
                wq=wq, bq=bq, wk=wk, bk=bk, wv=wv, bv=bv, wo=wo, bo=bo,
                w1=w1, b1=b1, w2=w2, b2=b2,
                ln1_a=one, ln1_b=zero, ln2_a=one, ln2_b=zero)


def reference_forward(tokens, params, *, h, eps=1e-6, compute_dtype=jnp.float32):
    """Pure-JAX reference mirroring the intended PyTorch semantics.

    compute_dtype mirrors the kernel's MXU-input dtype (f32 accumulation)."""
    cd = compute_dtype
    D = params["emb"].shape[1]
    B, S = tokens.shape
    dk = D // h
    x = jnp.take(params["emb"], tokens, axis=0) * math.sqrt(D) + params["pe"][:S]

    def lin(val, w, b):
        return jnp.dot(val.astype(cd), w.astype(cd),
                       preferred_element_type=jnp.float32) + b

    q = lin(x, params["wq"], params["bq"]).reshape(B, S, h, dk).transpose(0, 2, 1, 3)
    k = lin(x, params["wk"], params["bk"]).reshape(B, S, h, dk).transpose(0, 2, 1, 3)
    v = lin(x, params["wv"], params["bv"]).reshape(B, S, h, dk).transpose(0, 2, 1, 3)
    sc = jnp.einsum("bhqd,bhkd->bhqk", q.astype(cd), k.astype(cd),
                    preferred_element_type=jnp.float32) / math.sqrt(dk)
    p = jax.nn.softmax(sc, axis=-1)
    attn = jnp.einsum("bhqk,bhkd->bhqd", p.astype(cd), v.astype(cd),
                      preferred_element_type=jnp.float32)
    attn = attn.transpose(0, 2, 1, 3).reshape(B, S, D)
    mha = lin(attn, params["wo"], params["bo"])

    def layer_norm(y, a, b):
        mu = jnp.mean(y, axis=-1, keepdims=True)
        cen = y - mu
        var = jnp.sum(cen * cen, axis=-1, keepdims=True) / (D - 1)
        return a[0, 0] * cen / jnp.sqrt(var + eps) + b[0, 0]

    n1 = layer_norm(x + mha, params["ln1_a"], params["ln1_b"])
    ff = lin(jnp.maximum(lin(n1, params["w1"], params["b1"]), 0.0),
             params["w2"], params["b2"])
    return layer_norm(ff + n1, params["ln2_a"], params["ln2_b"])


if __name__ == "__main__":
    DIM_MODEL, H, VOCAB, SEQ_LEN, UNITS, BATCH = 32, 4, 50, 8, 64, 2

    key = jax.random.PRNGKey(0)
    kp, kt = jax.random.split(key)
    params = init_params(kp, DIM_MODEL, H, VOCAB, SEQ_LEN, UNITS)
    tokens = jax.random.randint(kt, (BATCH, SEQ_LEN), 0, VOCAB, dtype=jnp.int32)

    # f32 MXU inputs: tight check against the pure-JAX reference
    # (tolerance allows the EUP approx-reciprocal softmax denominator).
    out_f32 = jax.block_until_ready(encoder_forward(tokens, params, h=H))
    ref_f32 = reference_forward(tokens, params, h=H)
    np.testing.assert_allclose(np.asarray(out_f32), np.asarray(ref_f32),
                               rtol=1e-2, atol=1e-2)

    # bf16 MXU inputs (fast path on v5e/v6e/v7x); softmax / LayerNorm stats and
    # accumulation remain f32.  Compared against a bf16-matmul reference.
    out_bf16 = jax.block_until_ready(
        encoder_forward(tokens, params, h=H, compute_dtype=jnp.bfloat16))
    ref_bf16 = reference_forward(tokens, params, h=H, compute_dtype=jnp.bfloat16)
    np.testing.assert_allclose(np.asarray(out_bf16), np.asarray(ref_bf16),
                               rtol=3e-2, atol=3e-2)

    print("KERNEL_OK")
</pallas_src>

<mosaic_0001>
module attributes {stable_mosaic.version = 11 : i64} {
  func.func @encoder_kernel(%arg0: i32, %arg1: memref<1x8x32xf32, #tpu.memory_space<vmem>>, %arg2: memref<8x32xf32, #tpu.memory_space<vmem>>, %arg3: memref<32x96xf32, #tpu.memory_space<vmem>>, %arg4: memref<1x96xf32, #tpu.memory_space<vmem>>, %arg5: memref<32x32xf32, #tpu.memory_space<vmem>>, %arg6: memref<1x32xf32, #tpu.memory_space<vmem>>, %arg7: memref<32x64xf32, #tpu.memory_space<vmem>>, %arg8: memref<1x64xf32, #tpu.memory_space<vmem>>, %arg9: memref<64x32xf32, #tpu.memory_space<vmem>>, %arg10: memref<1x32xf32, #tpu.memory_space<vmem>>, %arg11: memref<1x1xf32, #tpu.memory_space<smem>>, %arg12: memref<1x1xf32, #tpu.memory_space<smem>>, %arg13: memref<1x1xf32, #tpu.memory_space<smem>>, %arg14: memref<1x1xf32, #tpu.memory_space<smem>>, %arg15: memref<1x8x32xf32, #tpu.memory_space<vmem>>, %arg16: memref<8x32xf32, #tpu.memory_space<vmem>>) attributes {dimension_semantics = [#tpu.dimension_semantics<parallel>], iteration_bounds = array<i64: 2>, scalar_prefetch = 0 : i64, scratch_operands = 1 : i64, tpu.core_type = #tpu.core_type<tc>, window_params = [{transform_indices = @transform_0, window_bounds = array<i64: 1, 8, 32>}, {pipeline_mode = #tpu.pipeline_mode<synchronous>, transform_indices = @transform_1, window_bounds = array<i64: 8, 32>}, {pipeline_mode = #tpu.pipeline_mode<synchronous>, transform_indices = @transform_2, window_bounds = array<i64: 32, 96>}, {pipeline_mode = #tpu.pipeline_mode<synchronous>, transform_indices = @transform_3, window_bounds = array<i64: 1, 96>}, {pipeline_mode = #tpu.pipeline_mode<synchronous>, transform_indices = @transform_4, window_bounds = array<i64: 32, 32>}, {pipeline_mode = #tpu.pipeline_mode<synchronous>, transform_indices = @transform_5, window_bounds = array<i64: 1, 32>}, {pipeline_mode = #tpu.pipeline_mode<synchronous>, transform_indices = @transform_6, window_bounds = array<i64: 32, 64>}, {pipeline_mode = #tpu.pipeline_mode<synchronous>, transform_indices = @transform_7, window_bounds = array<i64: 1, 64>}, {pipeline_mode = #tpu.pipeline_mode<synchronous>, transform_indices = @transform_8, window_bounds = array<i64: 64, 32>}, {pipeline_mode = #tpu.pipeline_mode<synchronous>, transform_indices = @transform_9, window_bounds = array<i64: 1, 32>}, {transform_indices = @transform_10, window_bounds = array<i64: 1, 1>}, {transform_indices = @transform_11, window_bounds = array<i64: 1, 1>}, {transform_indices = @transform_12, window_bounds = array<i64: 1, 1>}, {transform_indices = @transform_13, window_bounds = array<i64: 1, 1>}, {transform_indices = @transform_14, window_bounds = array<i64: 1, 8, 32>}]} {
    %c0 = arith.constant 0 : index
    %c0_0 = arith.constant 0 : index
    %c0_1 = arith.constant 0 : index
    %0 = vector.load %arg1[%c0, %c0_0, %c0_1] : memref<1x8x32xf32, #tpu.memory_space<vmem>>, vector<1x8x32xf32>
    %cst = arith.constant 5.65685415 : f32
    %1 = vector.broadcast %cst : f32 to vector<1x8x32xf32>
    %2 = arith.mulf %0, %1 : vector<1x8x32xf32>
    %c0_2 = arith.constant 0 : index
    %c0_3 = arith.constant 0 : index
    %3 = vector.load %arg2[%c0_2, %c0_3] : memref<8x32xf32, #tpu.memory_space<vmem>>, vector<8x32xf32>
    %4 = vector.shape_cast %3 : vector<8x32xf32> to vector<1x8x32xf32>
    %5 = arith.addf %2, %4 : vector<1x8x32xf32>
    %6 = vector.shape_cast %5 : vector<1x8x32xf32> to vector<8x32xf32>
    %c0_4 = arith.constant 0 : index
    %c0_5 = arith.constant 0 : index
    %7 = vector.load %arg3[%c0_4, %c0_5] : memref<32x96xf32, #tpu.memory_space<vmem>>, vector<32x96xf32>
    %cst_6 = arith.constant dense<0.000000e+00> : vector<8x96xf32>
    %8 = tpu.matmul %6, %7, %cst_6 {dimension_numbers = #tpu.dot_dimension_numbers<[1], [0], [0], [1], [0, 0, 1, 1], [], []>} : vector<8x32xf32>, vector<32x96xf32>, vector<8x96xf32> -> vector<8x96xf32>
    %c0_7 = arith.constant 0 : index
    %c0_8 = arith.constant 0 : index
    %9 = vector.load %arg4[%c0_7, %c0_8] : memref<1x96xf32, #tpu.memory_space<vmem>>, vector<1x96xf32>
    %10 = vector.broadcast %9 : vector<1x96xf32> to vector<8x96xf32>
    %11 = arith.addf %8, %10 : vector<8x96xf32>
    %12 = vector.extract_strided_slice %11 {offsets = [0, 0], sizes = [8, 32], strides = [1, 1]} : vector<8x96xf32> to vector<8x32xf32>
    %13 = vector.shape_cast %12 : vector<8x32xf32> to vector<1x8x32xf32>
    %14 = vector.extract_strided_slice %11 {offsets = [0, 32], sizes = [8, 32], strides = [1, 1]} : vector<8x96xf32> to vector<8x32xf32>
    %15 = vector.shape_cast %14 : vector<8x32xf32> to vector<1x8x32xf32>
    %16 = vector.extract_strided_slice %11 {offsets = [0, 64], sizes = [8, 32], strides = [1, 1]} : vector<8x96xf32> to vector<8x32xf32>
    %17 = vector.shape_cast %16 : vector<8x32xf32> to vector<1x8x32xf32>
    %c0_9 = arith.constant 0 : index
    %c0_10 = arith.constant 0 : index
    %18 = vector.load %arg5[%c0_9, %c0_10] : memref<32x32xf32, #tpu.memory_space<vmem>>, vector<32x32xf32>
    %cst_11 = arith.constant 0.000000e+00 : f32
    %19 = vector.broadcast %cst_11 : f32 to vector<8x32xf32>
    %c0_12 = arith.constant 0 : index
    %c0_13 = arith.constant 0 : index
    %20 = vector.load %arg16[%c0_12, %c0_13] : memref<8x32xf32, #tpu.memory_space<vmem>>, vector<8x32xf32>
    tpu.vector_store %arg16[%c0_12, %c0_13], %19 {strides = array<i32>} : memref<8x32xf32, #tpu.memory_space<vmem>>, vector<8x32xf32>,
    %21 = vector.extract_strided_slice %13 {offsets = [0, 0, 0], sizes = [1, 8, 8], strides = [1, 1, 1]} : vector<1x8x32xf32> to vector<1x8x8xf32>
    %22 = vector.extract_strided_slice %15 {offsets = [0, 0, 0], sizes = [1, 8, 8], strides = [1, 1, 1]} : vector<1x8x32xf32> to vector<1x8x8xf32>
    %23 = vector.extract_strided_slice %17 {offsets = [0, 0, 0], sizes = [1, 8, 8], strides = [1, 1, 1]} : vector<1x8x32xf32> to vector<1x8x8xf32>
    %cst_14 = arith.constant dense<0.000000e+00> : vector<1x8x8xf32>
    %24 = tpu.matmul %21, %22, %cst_14 {dimension_numbers = #tpu.dot_dimension_numbers<[2], [2], [1], [1], [0, 0, 0, 1, 1, 1], [0], [0]>} : vector<1x8x8xf32>, vector<1x8x8xf32>, vector<1x8x8xf32> -> vector<1x8x8xf32>
    %cst_15 = arith.constant 0.353553385 : f32
    %25 = vector.broadcast %cst_15 : f32 to vector<1x8x8xf32>
    %26 = arith.mulf %24, %25 : vector<1x8x8xf32>
    %cst_16 = arith.constant dense<0xFF800000> : vector<1x8xf32>
    %27 = vector.multi_reduction <maximumf>, %26, %cst_16 [2] : vector<1x8x8xf32> to vector<1x8xf32>
    %28 = vector.shape_cast %27 : vector<1x8xf32> to vector<1x8x1xf32>
    %29 = vector.broadcast %28 : vector<1x8x1xf32> to vector<1x8x8xf32>
    %30 = arith.subf %26, %29 : vector<1x8x8xf32>
    %31 = math.exp %30 : vector<1x8x8xf32>
    %cst_17 = arith.constant dense<0.000000e+00> : vector<1x8xf32>
    %32 = vector.multi_reduction <add>, %31, %cst_17 [2] : vector<1x8x8xf32> to vector<1x8xf32>
    %33 = vector.shape_cast %32 : vector<1x8xf32> to vector<1x8x1xf32>
    %34 = tpu.reciprocal %33 {approx = true} : vector<1x8x1xf32> -> vector<1x8x1xf32>
    %35 = vector.broadcast %34 : vector<1x8x1xf32> to vector<1x8x8xf32>
    %36 = arith.mulf %31, %35 : vector<1x8x8xf32>
    %cst_18 = arith.constant dense<0.000000e+00> : vector<1x8x8xf32>
    %37 = tpu.matmul %36, %23, %cst_18 {dimension_numbers = #tpu.dot_dimension_numbers<[2], [1], [1], [2], [0, 0, 0, 1, 1, 2], [0], [0]>} : vector<1x8x8xf32>, vector<1x8x8xf32>, vector<1x8x8xf32> -> vector<1x8x8xf32>
    %c0_19 = arith.constant 0 : index
    %c0_20 = arith.constant 0 : index
    %38 = vector.load %arg16[%c0_19, %c0_20] : memref<8x32xf32, #tpu.memory_space<vmem>>, vector<8x32xf32>
    %39 = vector.shape_cast %37 : vector<1x8x8xf32> to vector<8x8xf32>
    %40 = vector.extract_strided_slice %18 {offsets = [0, 0], sizes = [8, 32], strides = [1, 1]} : vector<32x32xf32> to vector<8x32xf32>
    %cst_21 = arith.constant dense<0.000000e+00> : vector<8x32xf32>
    %41 = tpu.matmul %39, %40, %cst_21 {dimension_numbers = #tpu.dot_dimension_numbers<[1], [0], [0], [1], [0, 0, 1, 1], [], []>} : vector<8x8xf32>, vector<8x32xf32>, vector<8x32xf32> -> vector<8x32xf32>
    %42 = arith.addf %38, %41 : vector<8x32xf32>
    %c0_22 = arith.constant 0 : index
    %c0_23 = arith.constant 0 : index
    %43 = vector.load %arg16[%c0_22, %c0_23] : memref<8x32xf32, #tpu.memory_space<vmem>>, vector<8x32xf32>
    tpu.vector_store %arg16[%c0_22, %c0_23], %42 {strides = array<i32>} : memref<8x32xf32, #tpu.memory_space<vmem>>, vector<8x32xf32>,
    %44 = vector.extract_strided_slice %13 {offsets = [0, 0, 8], sizes = [1, 8, 8], strides = [1, 1, 1]} : vector<1x8x32xf32> to vector<1x8x8xf32>
    %45 = vector.extract_strided_slice %15 {offsets = [0, 0, 8], sizes = [1, 8, 8], strides = [1, 1, 1]} : vector<1x8x32xf32> to vector<1x8x8xf32>
    %46 = vector.extract_strided_slice %17 {offsets = [0, 0, 8], sizes = [1, 8, 8], strides = [1, 1, 1]} : vector<1x8x32xf32> to vector<1x8x8xf32>
    %cst_24 = arith.constant dense<0.000000e+00> : vector<1x8x8xf32>
    %47 = tpu.matmul %44, %45, %cst_24 {dimension_numbers = #tpu.dot_dimension_numbers<[2], [2], [1], [1], [0, 0, 0, 1, 1, 1], [0], [0]>} : vector<1x8x8xf32>, vector<1x8x8xf32>, vector<1x8x8xf32> -> vector<1x8x8xf32>
    %cst_25 = arith.constant 0.353553385 : f32
    %48 = vector.broadcast %cst_25 : f32 to vector<1x8x8xf32>
    %49 = arith.mulf %47, %48 : vector<1x8x8xf32>
    %cst_26 = arith.constant dense<0xFF800000> : vector<1x8xf32>
    %50 = vector.multi_reduction <maximumf>, %49, %cst_26 [2] : vector<1x8x8xf32> to vector<1x8xf32>
    %51 = vector.shape_cast %50 : vector<1x8xf32> to vector<1x8x1xf32>
    %52 = vector.broadcast %51 : vector<1x8x1xf32> to vector<1x8x8xf32>
    %53 = arith.subf %49, %52 : vector<1x8x8xf32>
    %54 = math.exp %53 : vector<1x8x8xf32>
    %cst_27 = arith.constant dense<0.000000e+00> : vector<1x8xf32>
    %55 = vector.multi_reduction <add>, %54, %cst_27 [2] : vector<1x8x8xf32> to vector<1x8xf32>
    %56 = vector.shape_cast %55 : vector<1x8xf32> to vector<1x8x1xf32>
    %57 = tpu.reciprocal %56 {approx = true} : vector<1x8x1xf32> -> vector<1x8x1xf32>
    %58 = vector.broadcast %57 : vector<1x8x1xf32> to vector<1x8x8xf32>
    %59 = arith.mulf %54, %58 : vector<1x8x8xf32>
    %cst_28 = arith.constant dense<0.000000e+00> : vector<1x8x8xf32>
    %60 = tpu.matmul %59, %46, %cst_28 {dimension_numbers = #tpu.dot_dimension_numbers<[2], [1], [1], [2], [0, 0, 0, 1, 1, 2], [0], [0]>} : vector<1x8x8xf32>, vector<1x8x8xf32>, vector<1x8x8xf32> -> vector<1x8x8xf32>
    %c0_29 = arith.constant 0 : index
    %c0_30 = arith.constant 0 : index
    %61 = vector.load %arg16[%c0_29, %c0_30] : memref<8x32xf32, #tpu.memory_space<vmem>>, vector<8x32xf32>
    %62 = vector.shape_cast %60 : vector<1x8x8xf32> to vector<8x8xf32>
    %63 = vector.extract_strided_slice %18 {offsets = [8, 0], sizes = [8, 32], strides = [1, 1]} : vector<32x32xf32> to vector<8x32xf32>
    %cst_31 = arith.constant dense<0.000000e+00> : vector<8x32xf32>
    %64 = tpu.matmul %62, %63, %cst_31 {dimension_numbers = #tpu.dot_dimension_numbers<[1], [0], [0], [1], [0, 0, 1, 1], [], []>} : vector<8x8xf32>, vector<8x32xf32>, vector<8x32xf32> -> vector<8x32xf32>
    %65 = arith.addf %61, %64 : vector<8x32xf32>
    %c0_32 = arith.constant 0 : index
    %c0_33 = arith.constant 0 : index
    %66 = vector.load %arg16[%c0_32, %c0_33] : memref<8x32xf32, #tpu.memory_space<vmem>>, vector<8x32xf32>
    tpu.vector_store %arg16[%c0_32, %c0_33], %65 {strides = array<i32>} : memref<8x32xf32, #tpu.memory_space<vmem>>, vector<8x32xf32>,
    %67 = vector.extract_strided_slice %13 {offsets = [0, 0, 16], sizes = [1, 8, 8], strides = [1, 1, 1]} : vector<1x8x32xf32> to vector<1x8x8xf32>
    %68 = vector.extract_strided_slice %15 {offsets = [0, 0, 16], sizes = [1, 8, 8], strides = [1, 1, 1]} : vector<1x8x32xf32> to vector<1x8x8xf32>
    %69 = vector.extract_strided_slice %17 {offsets = [0, 0, 16], sizes = [1, 8, 8], strides = [1, 1, 1]} : vector<1x8x32xf32> to vector<1x8x8xf32>
    %cst_34 = arith.constant dense<0.000000e+00> : vector<1x8x8xf32>
    %70 = tpu.matmul %67, %68, %cst_34 {dimension_numbers = #tpu.dot_dimension_numbers<[2], [2], [1], [1], [0, 0, 0, 1, 1, 1], [0], [0]>} : vector<1x8x8xf32>, vector<1x8x8xf32>, vector<1x8x8xf32> -> vector<1x8x8xf32>
    %cst_35 = arith.constant 0.353553385 : f32
    %71 = vector.broadcast %cst_35 : f32 to vector<1x8x8xf32>
    %72 = arith.mulf %70, %71 : vector<1x8x8xf32>
    %cst_36 = arith.constant dense<0xFF800000> : vector<1x8xf32>
    %73 = vector.multi_reduction <maximumf>, %72, %cst_36 [2] : vector<1x8x8xf32> to vector<1x8xf32>
    %74 = vector.shape_cast %73 : vector<1x8xf32> to vector<1x8x1xf32>
    %75 = vector.broadcast %74 : vector<1x8x1xf32> to vector<1x8x8xf32>
    %76 = arith.subf %72, %75 : vector<1x8x8xf32>
    %77 = math.exp %76 : vector<1x8x8xf32>
    %cst_37 = arith.constant dense<0.000000e+00> : vector<1x8xf32>
    %78 = vector.multi_reduction <add>, %77, %cst_37 [2] : vector<1x8x8xf32> to vector<1x8xf32>
    %79 = vector.shape_cast %78 : vector<1x8xf32> to vector<1x8x1xf32>
    %80 = tpu.reciprocal %79 {approx = true} : vector<1x8x1xf32> -> vector<1x8x1xf32>
    %81 = vector.broadcast %80 : vector<1x8x1xf32> to vector<1x8x8xf32>
    %82 = arith.mulf %77, %81 : vector<1x8x8xf32>
    %cst_38 = arith.constant dense<0.000000e+00> : vector<1x8x8xf32>
    %83 = tpu.matmul %82, %69, %cst_38 {dimension_numbers = #tpu.dot_dimension_numbers<[2], [1], [1], [2], [0, 0, 0, 1, 1, 2], [0], [0]>} : vector<1x8x8xf32>, vector<1x8x8xf32>, vector<1x8x8xf32> -> vector<1x8x8xf32>
    %c0_39 = arith.constant 0 : index
    %c0_40 = arith.constant 0 : index
    %84 = vector.load %arg16[%c0_39, %c0_40] : memref<8x32xf32, #tpu.memory_space<vmem>>, vector<8x32xf32>
    %85 = vector.shape_cast %83 : vector<1x8x8xf32> to vector<8x8xf32>
    %86 = vector.extract_strided_slice %18 {offsets = [16, 0], sizes = [8, 32], strides = [1, 1]} : vector<32x32xf32> to vector<8x32xf32>
    %cst_41 = arith.constant dense<0.000000e+00> : vector<8x32xf32>
    %87 = tpu.matmul %85, %86, %cst_41 {dimension_numbers = #tpu.dot_dimension_numbers<[1], [0], [0], [1], [0, 0, 1, 1], [], []>} : vector<8x8xf32>, vector<8x32xf32>, vector<8x32xf32> -> vector<8x32xf32>
    %88 = arith.addf %84, %87 : vector<8x32xf32>
    %c0_42 = arith.constant 0 : index
    %c0_43 = arith.constant 0 : index
    %89 = vector.load %arg16[%c0_42, %c0_43] : memref<8x32xf32, #tpu.memory_space<vmem>>, vector<8x32xf32>
    tpu.vector_store %arg16[%c0_42, %c0_43], %88 {strides = array<i32>} : memref<8x32xf32, #tpu.memory_space<vmem>>, vector<8x32xf32>,
    %90 = vector.extract_strided_slice %13 {offsets = [0, 0, 24], sizes = [1, 8, 8], strides = [1, 1, 1]} : vector<1x8x32xf32> to vector<1x8x8xf32>
    %91 = vector.extract_strided_slice %15 {offsets = [0, 0, 24], sizes = [1, 8, 8], strides = [1, 1, 1]} : vector<1x8x32xf32> to vector<1x8x8xf32>
    %92 = vector.extract_strided_slice %17 {offsets = [0, 0, 24], sizes = [1, 8, 8], strides = [1, 1, 1]} : vector<1x8x32xf32> to vector<1x8x8xf32>
    %cst_44 = arith.constant dense<0.000000e+00> : vector<1x8x8xf32>
    %93 = tpu.matmul %90, %91, %cst_44 {dimension_numbers = #tpu.dot_dimension_numbers<[2], [2], [1], [1], [0, 0, 0, 1, 1, 1], [0], [0]>} : vector<1x8x8xf32>, vector<1x8x8xf32>, vector<1x8x8xf32> -> vector<1x8x8xf32>
    %cst_45 = arith.constant 0.353553385 : f32
    %94 = vector.broadcast %cst_45 : f32 to vector<1x8x8xf32>
    %95 = arith.mulf %93, %94 : vector<1x8x8xf32>
    %cst_46 = arith.constant dense<0xFF800000> : vector<1x8xf32>
    %96 = vector.multi_reduction <maximumf>, %95, %cst_46 [2] : vector<1x8x8xf32> to vector<1x8xf32>
    %97 = vector.shape_cast %96 : vector<1x8xf32> to vector<1x8x1xf32>
    %98 = vector.broadcast %97 : vector<1x8x1xf32> to vector<1x8x8xf32>
    %99 = arith.subf %95, %98 : vector<1x8x8xf32>
    %100 = math.exp %99 : vector<1x8x8xf32>
    %cst_47 = arith.constant dense<0.000000e+00> : vector<1x8xf32>
    %101 = vector.multi_reduction <add>, %100, %cst_47 [2] : vector<1x8x8xf32> to vector<1x8xf32>
    %102 = vector.shape_cast %101 : vector<1x8xf32> to vector<1x8x1xf32>
    %103 = tpu.reciprocal %102 {approx = true} : vector<1x8x1xf32> -> vector<1x8x1xf32>
    %104 = vector.broadcast %103 : vector<1x8x1xf32> to vector<1x8x8xf32>
    %105 = arith.mulf %100, %104 : vector<1x8x8xf32>
    %cst_48 = arith.constant dense<0.000000e+00> : vector<1x8x8xf32>
    %106 = tpu.matmul %105, %92, %cst_48 {dimension_numbers = #tpu.dot_dimension_numbers<[2], [1], [1], [2], [0, 0, 0, 1, 1, 2], [0], [0]>} : vector<1x8x8xf32>, vector<1x8x8xf32>, vector<1x8x8xf32> -> vector<1x8x8xf32>
    %c0_49 = arith.constant 0 : index
    %c0_50 = arith.constant 0 : index
    %107 = vector.load %arg16[%c0_49, %c0_50] : memref<8x32xf32, #tpu.memory_space<vmem>>, vector<8x32xf32>
    %108 = vector.shape_cast %106 : vector<1x8x8xf32> to vector<8x8xf32>
    %109 = vector.extract_strided_slice %18 {offsets = [24, 0], sizes = [8, 32], strides = [1, 1]} : vector<32x32xf32> to vector<8x32xf32>
    %cst_51 = arith.constant dense<0.000000e+00> : vector<8x32xf32>
    %110 = tpu.matmul %108, %109, %cst_51 {dimension_numbers = #tpu.dot_dimension_numbers<[1], [0], [0], [1], [0, 0, 1, 1], [], []>} : vector<8x8xf32>, vector<8x32xf32>, vector<8x32xf32> -> vector<8x32xf32>
    %111 = arith.addf %107, %110 : vector<8x32xf32>
    %c0_52 = arith.constant 0 : index
    %c0_53 = arith.constant 0 : index
    %112 = vector.load %arg16[%c0_52, %c0_53] : memref<8x32xf32, #tpu.memory_space<vmem>>, vector<8x32xf32>
    tpu.vector_store %arg16[%c0_52, %c0_53], %111 {strides = array<i32>} : memref<8x32xf32, #tpu.memory_space<vmem>>, vector<8x32xf32>,
    %c0_54 = arith.constant 0 : index
    %c0_55 = arith.constant 0 : index
    %113 = vector.load %arg16[%c0_54, %c0_55] : memref<8x32xf32, #tpu.memory_space<vmem>>, vector<8x32xf32>
    %c0_56 = arith.constant 0 : index
    %c0_57 = arith.constant 0 : index
    %114 = vector.load %arg6[%c0_56, %c0_57] : memref<1x32xf32, #tpu.memory_space<vmem>>, vector<1x32xf32>
    %115 = vector.broadcast %114 : vector<1x32xf32> to vector<8x32xf32>
    %116 = arith.addf %113, %115 : vector<8x32xf32>
    %117 = arith.addf %6, %116 : vector<8x32xf32>
    %cst_58 = arith.constant dense<0.000000e+00> : vector<8xf32>
    %118 = vector.multi_reduction <add>, %117, %cst_58 [1] : vector<8x32xf32> to vector<8xf32>
    %119 = vector.shape_cast %118 : vector<8xf32> to vector<8x1xf32>
    %cst_59 = arith.constant 3.200000e+01 : f32
    %120 = vector.broadcast %cst_59 : f32 to vector<8x1xf32>
    %121 = arith.divf %119, %120 : vector<8x1xf32>
    %122 = vector.broadcast %121 : vector<8x1xf32> to vector<8x32xf32>
    %123 = arith.subf %117, %122 : vector<8x32xf32>
    %124 = arith.mulf %123, %123 : vector<8x32xf32>
    %cst_60 = arith.constant dense<0.000000e+00> : vector<8xf32>
    %125 = vector.multi_reduction <add>, %124, %cst_60 [1] : vector<8x32xf32> to vector<8xf32>
    %126 = vector.shape_cast %125 : vector<8xf32> to vector<8x1xf32>
    %cst_61 = arith.constant 3.100000e+01 : f32
    %127 = vector.broadcast %cst_61 : f32 to vector<8x1xf32>
    %128 = arith.divf %126, %127 : vector<8x1xf32>
    %c0_62 = arith.constant 0 : index
    %c0_63 = arith.constant 0 : index
    %129 = memref.load %arg11[%c0_62, %c0_63] : memref<1x1xf32, #tpu.memory_space<smem>>
    %130 = vector.broadcast %129 : f32 to vector<8x32xf32>
    %131 = arith.mulf %130, %123 : vector<8x32xf32>
    %cst_64 = arith.constant 9.99999997E-7 : f32
    %132 = vector.broadcast %cst_64 : f32 to vector<8x1xf32>
    %133 = arith.addf %128, %132 : vector<8x1xf32>
    %134 = math.rsqrt %133 : vector<8x1xf32>
    %135 = vector.broadcast %134 : vector<8x1xf32> to vector<8x32xf32>
    %136 = arith.mulf %131, %135 : vector<8x32xf32>
    %c0_65 = arith.constant 0 : index
    %c0_66 = arith.constant 0 : index
    %137 = memref.load %arg12[%c0_65, %c0_66] : memref<1x1xf32, #tpu.memory_space<smem>>
    %138 = vector.broadcast %137 : f32 to vector<8x32xf32>
    %139 = arith.addf %136, %138 : vector<8x32xf32>
    %c0_67 = arith.constant 0 : index
    %c0_68 = arith.constant 0 : index
    %140 = vector.load %arg7[%c0_67, %c0_68] : memref<32x64xf32, #tpu.memory_space<vmem>>, vector<32x64xf32>
    %cst_69 = arith.constant dense<0.000000e+00> : vector<8x64xf32>
    %141 = tpu.matmul %139, %140, %cst_69 {dimension_numbers = #tpu.dot_dimension_numbers<[1], [0], [0], [1], [0, 0, 1, 1], [], []>} : vector<8x32xf32>, vector<32x64xf32>, vector<8x64xf32> -> vector<8x64xf32>
    %c0_70 = arith.constant 0 : index
    %c0_71 = arith.constant 0 : index
    %142 = vector.load %arg8[%c0_70, %c0_71] : memref<1x64xf32, #tpu.memory_space<vmem>>, vector<1x64xf32>
    %143 = vector.broadcast %142 : vector<1x64xf32> to vector<8x64xf32>
    %144 = arith.addf %141, %143 : vector<8x64xf32>
    %cst_72 = arith.constant 0.000000e+00 : f32
    %145 = vector.broadcast %cst_72 : f32 to vector<8x64xf32>
    %146 = arith.maximumf %144, %145 : vector<8x64xf32>
    %c0_73 = arith.constant 0 : index
    %c0_74 = arith.constant 0 : index
    %147 = vector.load %arg9[%c0_73, %c0_74] : memref<64x32xf32, #tpu.memory_space<vmem>>, vector<64x32xf32>
    %cst_75 = arith.constant dense<0.000000e+00> : vector<8x32xf32>
    %148 = tpu.matmul %146, %147, %cst_75 {dimension_numbers = #tpu.dot_dimension_numbers<[1], [0], [0], [1], [0, 0, 1, 1], [], []>} : vector<8x64xf32>, vector<64x32xf32>, vector<8x32xf32> -> vector<8x32xf32>
    %c0_76 = arith.constant 0 : index
    %c0_77 = arith.constant 0 : index
    %149 = vector.load %arg10[%c0_76, %c0_77] : memref<1x32xf32, #tpu.memory_space<vmem>>, vector<1x32xf32>
    %150 = vector.broadcast %149 : vector<1x32xf32> to vector<8x32xf32>
    %151 = arith.addf %148, %150 : vector<8x32xf32>
    %152 = arith.addf %151, %139 : vector<8x32xf32>
    %cst_78 = arith.constant dense<0.000000e+00> : vector<8xf32>
    %153 = vector.multi_reduction <add>, %152, %cst_78 [1] : vector<8x32xf32> to vector<8xf32>
    %154 = vector.shape_cast %153 : vector<8xf32> to vector<8x1xf32>
    %cst_79 = arith.constant 3.200000e+01 : f32
    %155 = vector.broadcast %cst_79 : f32 to vector<8x1xf32>
    %156 = arith.divf %154, %155 : vector<8x1xf32>
    %157 = vector.broadcast %156 : vector<8x1xf32> to vector<8x32xf32>
    %158 = arith.subf %152, %157 : vector<8x32xf32>
    %159 = arith.mulf %158, %158 : vector<8x32xf32>
    %cst_80 = arith.constant dense<0.000000e+00> : vector<8xf32>
    %160 = vector.multi_reduction <add>, %159, %cst_80 [1] : vector<8x32xf32> to vector<8xf32>
    %161 = vector.shape_cast %160 : vector<8xf32> to vector<8x1xf32>
    %cst_81 = arith.constant 3.100000e+01 : f32
    %162 = vector.broadcast %cst_81 : f32 to vector<8x1xf32>
    %163 = arith.divf %161, %162 : vector<8x1xf32>
    %c0_82 = arith.constant 0 : index
    %c0_83 = arith.constant 0 : index
    %164 = memref.load %arg13[%c0_82, %c0_83] : memref<1x1xf32, #tpu.memory_space<smem>>
    %165 = vector.broadcast %164 : f32 to vector<8x32xf32>
    %166 = arith.mulf %165, %158 : vector<8x32xf32>
    %cst_84 = arith.constant 9.99999997E-7 : f32
    %167 = vector.broadcast %cst_84 : f32 to vector<8x1xf32>
    %168 = arith.addf %163, %167 : vector<8x1xf32>
    %169 = math.rsqrt %168 : vector<8x1xf32>
    %170 = vector.broadcast %169 : vector<8x1xf32> to vector<8x32xf32>
    %171 = arith.mulf %166, %170 : vector<8x32xf32>
    %c0_85 = arith.constant 0 : index
    %c0_86 = arith.constant 0 : index
    %172 = memref.load %arg14[%c0_85, %c0_86] : memref<1x1xf32, #tpu.memory_space<smem>>
    %173 = vector.broadcast %172 : f32 to vector<8x32xf32>
    %174 = arith.addf %171, %173 : vector<8x32xf32>
    %175 = vector.shape_cast %174 : vector<8x32xf32> to vector<1x8x32xf32>
    %c0_87 = arith.constant 0 : index
    %c0_88 = arith.constant 0 : index
    %c0_89 = arith.constant 0 : index
    %176 = vector.load %arg15[%c0_87, %c0_88, %c0_89] : memref<1x8x32xf32, #tpu.memory_space<vmem>>, vector<1x8x32xf32>
    tpu.vector_store %arg15[%c0_87, %c0_88, %c0_89], %175 {strides = array<i32>} : memref<1x8x32xf32, #tpu.memory_space<vmem>>, vector<1x8x32xf32>,
    return
  }
  func.func @transform_0(%arg0: i32) -> (i32, i32, i32) {
    %c0_i32 = arith.constant 0 : i32
    %c0_i32_0 = arith.constant 0 : i32
    %c0_i32_1 = arith.constant 0 : i32
    return %arg0, %c0_i32, %c0_i32_0 : i32, i32, i32
  }
  func.func @transform_1(%arg0: i32) -> (i32, i32) {
    %c0_i32 = arith.constant 0 : i32
    %c0_i32_0 = arith.constant 0 : i32
    %c0_i32_1 = arith.constant 0 : i32
    return %c0_i32, %c0_i32_0 : i32, i32
  }
  func.func @transform_2(%arg0: i32) -> (i32, i32) {
    %c0_i32 = arith.constant 0 : i32
    %c0_i32_0 = arith.constant 0 : i32
    %c0_i32_1 = arith.constant 0 : i32
    return %c0_i32, %c0_i32_0 : i32, i32
  }
  func.func @transform_3(%arg0: i32) -> (i32, i32) {
    %c0_i32 = arith.constant 0 : i32
    %c0_i32_0 = arith.constant 0 : i32
    %c0_i32_1 = arith.constant 0 : i32
    return %c0_i32, %c0_i32_0 : i32, i32
  }
  func.func @transform_4(%arg0: i32) -> (i32, i32) {
    %c0_i32 = arith.constant 0 : i32
    %c0_i32_0 = arith.constant 0 : i32
    %c0_i32_1 = arith.constant 0 : i32
    return %c0_i32, %c0_i32_0 : i32, i32
  }
  func.func @transform_5(%arg0: i32) -> (i32, i32) {
    %c0_i32 = arith.constant 0 : i32
    %c0_i32_0 = arith.constant 0 : i32
    %c0_i32_1 = arith.constant 0 : i32
    return %c0_i32, %c0_i32_0 : i32, i32
  }
  func.func @transform_6(%arg0: i32) -> (i32, i32) {
    %c0_i32 = arith.constant 0 : i32
    %c0_i32_0 = arith.constant 0 : i32
    %c0_i32_1 = arith.constant 0 : i32
    return %c0_i32, %c0_i32_0 : i32, i32
  }
  func.func @transform_7(%arg0: i32) -> (i32, i32) {
    %c0_i32 = arith.constant 0 : i32
    %c0_i32_0 = arith.constant 0 : i32
    %c0_i32_1 = arith.constant 0 : i32
    return %c0_i32, %c0_i32_0 : i32, i32
  }
  func.func @transform_8(%arg0: i32) -> (i32, i32) {
    %c0_i32 = arith.constant 0 : i32
    %c0_i32_0 = arith.constant 0 : i32
    %c0_i32_1 = arith.constant 0 : i32
    return %c0_i32, %c0_i32_0 : i32, i32
  }
  func.func @transform_9(%arg0: i32) -> (i32, i32) {
    %c0_i32 = arith.constant 0 : i32
    %c0_i32_0 = arith.constant 0 : i32
    %c0_i32_1 = arith.constant 0 : i32
    return %c0_i32, %c0_i32_0 : i32, i32
  }
  func.func @transform_10(%arg0: i32) -> (i32, i32) {
    %c0_i32 = arith.constant 0 : i32
    %c0_i32_0 = arith.constant 0 : i32
    %c0_i32_1 = arith.constant 0 : i32
    return %c0_i32, %c0_i32_0 : i32, i32
  }
  func.func @transform_11(%arg0: i32) -> (i32, i32) {
    %c0_i32 = arith.constant 0 : i32
    %c0_i32_0 = arith.constant 0 : i32
    %c0_i32_1 = arith.constant 0 : i32
    return %c0_i32, %c0_i32_0 : i32, i32
  }
  func.func @transform_12(%arg0: i32) -> (i32, i32) {
    %c0_i32 = arith.constant 0 : i32
    %c0_i32_0 = arith.constant 0 : i32
    %c0_i32_1 = arith.constant 0 : i32
    return %c0_i32, %c0_i32_0 : i32, i32
  }
  func.func @transform_13(%arg0: i32) -> (i32, i32) {
    %c0_i32 = arith.constant 0 : i32
    %c0_i32_0 = arith.constant 0 : i32
    %c0_i32_1 = arith.constant 0 : i32
    return %c0_i32, %c0_i32_0 : i32, i32
  }
  func.func @transform_14(%arg0: i32) -> (i32, i32, i32) {
    %c0_i32 = arith.constant 0 : i32
    %c0_i32_0 = arith.constant 0 : i32
    %c0_i32_1 = arith.constant 0 : i32
    return %arg0, %c0_i32, %c0_i32_0 : i32, i32, i32
  }
}

</mosaic_0001>

<bundles_post_ra>
// kernel: tpu_custom_call.1
= control target key start
LH: loop header
LB: loop body
LE: loop exit
PB: predicated region body
PF: predicated region fallthrough
CT: control target
= control target key end

     0   :  { %s2688_s0 = inlined_call_operand.hbm [shape: f32[2,8,32], index: 0, kind: input, shape index: {}]   ;;  %s2689_s1 = inlined_call_operand.vmem [shape: f32[8,32], index: 1, kind: input, shape index: {}]   ;;  %s2690_s2 = inlined_call_operand.vmem [shape: f32[32,96], index: 2, kind: input, shape index: {}]   ;;  %s2691_s3 = inlined_call_operand.vmem [shape: f32[1,96], index: 3, kind: input, shape index: {}]   ;;  %s2692_s4 = inlined_call_operand.vmem [shape: f32[32,32], index: 4, kind: input, shape index: {}]   ;;  %s2693_s5 = inlined_call_operand.vmem [shape: f32[1,32], index: 5, kind: input, shape index: {}]   ;;  %s2694_s6 = inlined_call_operand.vmem [shape: f32[32,64], index: 6, kind: input, shape index: {}]   ;;  %s2695_s7 = inlined_call_operand.vmem [shape: f32[1,64], index: 7, kind: input, shape index: {}]   ;;  %s2696_s8 = inlined_call_operand.vmem [shape: f32[64,32], index: 8, kind: input, shape index: {}]   ;;  %s2697_s9 = inlined_call_operand.vmem [shape: f32[1,32], index: 9, kind: input, shape index: {}]   ;;  %s2698_s10 = inlined_call_operand.<no memory space> [shape: f32[1,1], index: 10, kind: input, shape index: {}]   ;;  %s2699_s11 = inlined_call_operand.<no memory space> [shape: f32[1,1], index: 11, kind: input, shape index: {}]   ;;  %s2700_s12 = inlined_call_operand.<no memory space> [shape: f32[1,1], index: 12, kind: input, shape index: {}]   ;;  %s2701_s14 = inlined_call_operand.hbm [shape: f32[2,8,32], index: 14, kind: output, shape index: {}]   ;;  %s2702_s13 = inlined_call_operand.<no memory space> [shape: f32[1,1], index: 13, kind: input, shape index: {}]  }
   0x1   :  { %19 = sst [smem:[#allocation3]] %s2698_s10 }
   0x2   :  { %20 = sst [smem:[#allocation4]] %s2699_s11 }
   0x3   :  { %21 = sst [smem:[#allocation5]] %s2700_s12 }
   0x4   :  { %22 = sst [smem:[#allocation6]] %s2702_s13 }
   0x5   :  { %23 = vsyncpa [#allocation8], 0 }
   0x6   :  { %25 = vsyncpa [#allocation8 + $0x1], 0 }
   0x7   :  { %26 = vsyncpa [#allocation9], 0 }
   0x8   :  { %28 = vsyncpa [#allocation9 + $0x1], 0  ;;  %s2343_s21 = smov 0   ;;  %s2345_s22 = smov 0  }
   0x9   :  { %s2347_s10 = smov 0   ;;  %s2349_s23 = smov 0  }
   0xa LB: > { %s2364_s11 = sadd.s32 4294967295, %s2238_s23   ;;  %s1859_s12 = sadd.s32 4294967294, %s2238_s23   ;;  %s2238_s23 = sphi %s2349_s23, %s2719_s23   ;;  %s2234_s10 = sphi %s2347_s10, %s2718_s10   ;;  %s2230_s22 = sphi %s2345_s22, %s2717_s22   ;;  %s2226_s21 = sphi %s2343_s21, %s2716_s21  }
   0xb   : > { %s2368_s13 = sadd.s32 1, %s2238_s23   ;;  %s41_s24 = sadd.s32 1, %s2234_s10 }
   0xc   : > { %s38_s25 = ssub.s32 %s2238_s23, %s2368_s13  ;;  %p48_p0 = scmp.ne.s32.totalorder %s2234_s10, %s2230_s22 }
   0xd   : > { %p39_p1 = scmp.eq.s32.totalorder %s38_s25, 0  ;;  %p49_p2 = scmp.eq.s32.totalorder %s2238_s23, 0 }
   0xe   : > { %p54_p3 = scmp.ne.s32.totalorder %s2230_s22, %s2226_s21  ;;  %p55_p4 = scmp.eq.s32.totalorder %s2364_s11, 0 }
   0xf   : > { %s2380_s26 = scalar_select %p39_p1, %s2234_s10, %s41_s24  }
  0x10   : > { %p2382_p5 = por %p49_p2, %p48_p0  ;;  %p2386_p6 = por %p55_p4, %p54_p3 }
  0x11   : > { %2704 = sst [smem:[#allocation13_spill]] %s2380_s26  ;;  %p351_p7 = scmp.eq.s32.totalorder %s2364_s11, 1 }
  0x12   : > { %p357_p8 = scmp.eq.s32.totalorder %s1859_s12, 1  ;;  %p2074_p10 = scmp.lt.s32.totalorder %s2238_s23, 2 }
  0x13   : > { %p2393_p11 = por %p351_p7, %p48_p0  ;;  %s416_s15 = sand.u32 1, %s2234_s10  }
  0x14   : > { %p2397_p12 = por %p357_p8, %p54_p3  ;;  %s1863_s16 = sshll.u32 %s2238_s23, 7 }
  0x15   : > { %s2707_s29 = scalar_select %p2393_p11, 1, 0 }
  0x16   : > { %s2708_s30 = scalar_select %p2397_p12, 1, 0 }
  0x17   : > { %s1862_s17 = sshll.u32 %s416_s15, 3  ;;  %s2406_s20 = scalar_lea.hbm %s2688_s0, %s1863_s16 }
  0x18   : > { %s420_s12 = scalar_lea.vmem [#allocation7], %s1862_s17  ;;  %p2410_p13 = pnand %p2074_p10, %p2382_p5 }
  0x19   : > { %s427_s24 = sshll.u32 %s420_s12, 4  ;;  %s417_s18 = scalar_lea.sflag [#allocation8], %s416_s15  ;;  %s2414_s24 = int_to_ptr.vmem [resolvable:$true] %s427_s24 }
  0x1a   : > { %s2142_s16 = scalar_lea.hbm %s2406_s20, 128  ;;  %p2144_p3 = pneg %p2410_p13 }
  0x1b   : > { %p2143_p2 = scmp.ne.s32.totalorder %s2406_s20, %s2142_s16  ;;  %s2147_s19 = scalar_lea.hbm %s2688_s0, 256 }
  0x1c   : > { %p2148_p5 = scmp.lt.u32.totalorder %s2406_s20, %s2688_s0  ;;  %p2149_p8 = scmp.lt.u32.totalorder %s2147_s19, %s2142_s16 }
  0x1d   : > { %p2145_p4 = pnand %p2144_p3, %p2143_p2  ;;  %p2151_p9 = scmp.lt.u32.totalorder %s2142_s16, %s2406_s20 }
  0x1e   : > { %p2150_p10 = por %p2149_p8, %p2148_p5 }
  0x1f   : > { %p2146_p7 = pneg %p2145_p4 }
  0x20   : > { %p2152_p0 = por %p2151_p9, %p2150_p10 }
  0x22   : > { %p2153_p1 = pnand %p2152_p0, %p2146_p7 }
  0x24   : > { %2156 = shalt.err (!%p2153_p1)
}
  0x25   : > { %s2157_s15 = scalar_lea.vmem %s2414_s24, 128  ;;  %s2240_s27 = smov [#allocation7]  }
  0x26   : > { %p2158_p2 = scmp.ne.s32.totalorder %s2414_s24, %s2157_s15  ;;  %s2162_s17 = sshll.u32 %s2240_s27, 4  ;;  %s2163_s17 = int_to_ptr.vmem [resolvable:$false] %s2162_s17 }
  0x27   : > { %s2164_s26 = scalar_lea.vmem %s2163_s17, 256  ;;  %p2165_p11 = scmp.lt.s32.totalorder %s2414_s24, %s2163_s17 }
  0x28   : > { %p2160_p4 = pnand %p2158_p2, %p2144_p3  ;;  %p2166_p5 = scmp.lt.s32.totalorder %s2164_s26, %s2157_s15 }
  0x2a   : > { %p2161_p12 = pneg %p2160_p4  ;;  %p2167_p8 = por %p2166_p5, %p2165_p11 }
  0x2c   : > { %p2168_p9 = pnand %p2167_p8, %p2161_p12 }
  0x2e   : > { %2171 = shalt.err (!%p2168_p9)
}
  0x2f   : > { %2069 = dma.hbm_to_vmem [thread:$0]  (!%p2410_p13), %s2406_s20, 128, %s2414_s24, %s417_s18  }
  0x30   : > { %p2710_p0 = scmp.lt.s32.totalorder %s2238_s23, 3  ;;  %p2711_p1 = scmp.ge.s32.totalorder %s2238_s23, 1 }
  0x32   : > { %p433_p3 = pnand %p2711_p1, %p2710_p0 }
  0x33   : > { %s2448_s16 = sand.u32 (!%p433_p3), 1, %s2230_s22  }
  0x34   : > { %436 = sbr.rel (%p433_p3) target bundleno = 4033 (0xfc1), region = 76  ;;  %s1865_s19 = sshll.u32 (!%p433_p3), %s2448_s16, 3 }
  0x35   : > { %s439_s12 = scalar_lea.sflag (!%p433_p3), [#allocation8], %s2448_s16  ;;  %s442_s25 = scalar_lea.vmem (!%p433_p3), [#allocation7], %s1865_s19 }
  0x3b   : > { %2217 = dma.done.wait (%p2386_p6), %s439_s12, 128  }
  0x3c   : > { %2219 = vsyncadd (%p2386_p6), %s439_s12, 4294967168  ;;  %vm502_vm0 = vcmask 261120   ;;  %v2241_v0 = vmov 0.0|0.0   ;;  %vm2242_vm1 = vmmov 0   ;;  %v2243_v1 = vmov 0.0   ;;  %v491_v2 = vld [vmem:[%s2690_s2] sm:$0xff] }
  0x3d   : > { %2038 = vmatprep.subr.bf16.mxu0 %v2241_v0  ;;  %1945 = vmatprep.mubr.msk.f32.mxu0 %vm2242_vm1, %v2243_v1  ;;  %580 = vst.msk [vmem:[#allocation2] sm:$0xff] %vm502_vm0, %v2243_v1  ;;  %v492_v3 = vld [vmem:[%s2690_s2 + $0x8] sm:$0xff]  ;;  %v493_v4 = vld [vmem:[%s2690_s2 + $0x10] sm:$0xff]  ;;  %v494_v6 = vld [vmem:[%s2690_s2 + $0x18] sm:$0xff]  ;;  %s2244_s24 = smov 64   ;;  %s2245_s18 = smov 96  }
  0x3e   : > { %1953 = vmatprep.subr.mxu1 %v2243_v1  ;;  %1955 = vmatprep.mubr.msk.f32.mxu1 %vm2242_vm1, %v2243_v1  ;;  %v2039_v5 = vpack.c.bf16 %v492_v3, %v491_v2  ;;  %v487_v7 = vld [vmem:[%s442_s25] sm:$0xff]  ;;  %v2042_v9 = vpack.c.bf16 %v494_v6, %v493_v4  ;;  %v489_v10 = vld [vmem:[%s2689_s1] sm:$0xff]  ;;  %s2246_s15 = smov 88   ;;  %vm584_vm2 = vcmask 64512   ;;  %s2247_s27 = smov 56   ;;  %vm1680_vm3 = vcmask 523264  }
  0x3f   : > { %v488_v8 = vmul.f32 5.656854, %v487_v7  ;;  %v1867_v12 = vld [vmem:[%s2691_s3] ss:$0 sm:$0xff]  ;;  %s2248_s17 = smov 80   ;;  %s2249_s26 = smov 120  }
  0x40   : > { %2040 = vmatpush3.bf16.msra.mxu0 %v2039_v5  ;;  %v576_v27 = vld [vmem:[%s2692_s4] sm:$0xff]  ;;  %s2250_s25 = smov 112   ;;  %v577_v54 = vld [vmem:[%s2692_s4 + $0x8] sm:$0xff]  ;;  %s2254_s12 = smov 40  }
  0x41   : > { %2041 = vmatprep.subr.bf16.mxu0 %v2241_v0  ;;  %v2482_v11 = vadd.f32 %v489_v10, %v488_v8  ;;  %s1776_s28 = scalar_lea.sflag [#allocation9], %s2448_s16  ;;  %p2712_p11 = scmp.ne.s32.totalorder %s2707_s29, 0 }
  0x44   : > { %2043 = vmatpush3.bf16.msra.mxu0 %v2042_v9  ;;  %v747_v45 = vld [vmem:[#allocation2] sm:$0xff] }
  0x45   : > { %1948 = vmatprep.subr.mxu0 %v2243_v1 }
  0x47   : > { %1946 = vmatmul.mubr.msk.f32.vlgmr.msra.gmra.mrb[0].mxu0 %vm502_vm0, %v2482_v11 }
  0x48   : > { %1950 = vmatprep.mubr.msk.f32.mxu0 %vm2242_vm1, %v2243_v1 }
 0x11a   : > { %v572_v13 = vpop.f32.mrb[0].mxu0 }
 0x11b   : > { %v2492_v14 = vadd.f32 %v1867_v12, %v572_v13  ;;  %v1947_v15 = vpop.f32.mrb[1].mxu0 }
 0x11d   : > { %671 = vrot.lane.b32.xlu1 %v2492_v14, %s2244_s24  ;;  %582 = vrot.lane.b32.xlu0 %v2492_v14, %s2245_s18  ;;  %s2251_s18 = smov 48  }
 0x121   : > { %825 = vrot.lane.b32.xlu1 %v2492_v14, %s2246_s15  ;;  %s2252_s15 = smov 72  }
 0x18f   : > { %v672_v16 = vpop.permute.xlu1 %671  ;;  %v583_v17 = vpop.permute.xlu0 %582 }
 0x190   : > { %1949 = vmatpush3.xpose.msk.msra.mxu0 %vm584_vm2, %v583_v17  ;;  %1954 = vmatpush3.msra.mxu1 %v672_v16  ;;  %v578_v16 = vld [vmem:[%s2692_s4 + $0x10] sm:$0xff] }
 0x191   : > { %1963 = vmatprep.subr.mxu1 %v2243_v1  ;;  %1958 = vmatprep.subr.mxu0 %v2243_v1 }
 0x193   : > { %1951 = vmatmul.mubr.msk.f32.vlgmr.msra.gmra.mrb[2].mxu0 %vm584_vm2, %v2492_v14  ;;  %v826_v28 = vpop.permute.xlu1 %825 }
 0x194   : > { %1960 = vmatprep.mubr.msk.f32.mxu0 %vm2242_vm1, %v2243_v1  ;;  %1959 = vmatpush3.msra.mxu0 %v576_v27 }
 0x195   : > { %1968 = vmatprep.subr.mxu0 %v2243_v1 }
 0x266   : > { %v655_v18 = vpop.f32.mrb[2].mxu0 }
 0x267   : > { %v659_v19 = vmul.f32 0.35355338, %v655_v18  ;;  %v1952_v20 = vpop.f32.mrb[3].mxu0 }
 0x269   : > { %v660_v21 = vsel %vm584_vm2, %v659_v19, -inf }
 0x26a   : > { %661 = vmax.xlane.f32.xlu0 %v660_v21 }
 0x280   : > { %913 = vrot.lane.b32.xlu0 %v2492_v14, %s2247_s27  ;;  %s2253_s27 = smov 104  }
 0x284   : > { %1067 = vrot.lane.b32.xlu0 %v2492_v14, %s2248_s17  ;;  %s486_s17 = scalar_lea.vmem [#allocation10], %s1865_s19 }
 0x2f7   : > { %v662_v22 = vpop.xlane.xlu0 %661 }
 0x2f8   : > { %v663_v23 = vsub.f32 %v659_v19, %v662_v22 }
 0x2fa   : > { %v664_v24 = vmul.f32 1.442695, %v663_v23 }
 0x2fb   : > { %v914_v34 = vpop.permute.xlu0 %913 }
 0x2fc   : > { %2122 = vpow2.f32 %v664_v24 }
 0x2ff   : > { %v1068_v49 = vpop.permute.xlu0 %1067 }
 0x306   : > { %v2123_v25 = vpop.eup %2122 }
 0x307   : > { %v666_v26 = vsel %vm584_vm2, %v2123_v25, 0.0 }
 0x308   : > { %667 = vadd.xlane.f32.xlu1 %v666_v26 }
 0x319   : > { %823 = vrot.lane.b32.xlu1 %v2492_v14, %s2249_s26  ;;  %s1789_s26 = sshll.u32 %s486_s17, 4  ;;  %s2645_s26 = int_to_ptr.vmem [resolvable:$true] %s1789_s26 }
 0x31a   : > { %s2172_s24 = scalar_lea.vmem %s2645_s26, 128 }
 0x31b   : > { %p2173_p6 = scmp.ne.s32.totalorder %s2645_s26, %s2172_s24 }
 0x31d   : > { %p2174_p12 = pnand %p2173_p6, %p2712_p11 }
 0x31f   : > { %p2175_p13 = pneg %p2174_p12 }
 0x395   : > { %v668_v29 = vpop.xlane.xlu1 %667 }
 0x396   : > { %2124 = vrcp.f32 %v668_v29 }
 0x399   : > { %v824_v32 = vpop.permute.xlu1 %823 }
 0x3a0   : > { %v2125_v30 = vpop.eup %2124 }
 0x3a1   : > { %v670_v31 = vmul.f32 %v2125_v30, %v2123_v25 }
 0x3a3   : > { %1956 = vmatmul.mubr.msk.f32.vlgmr.msra.gmra.mrb[0].mxu1 %vm584_vm2, %v670_v31 }
 0x3a4   : > { %1964 = vmatpush3.xpose.msk.msra.mxu1 %vm584_vm2, %v826_v28  ;;  %1965 = vmatprep.mubr.msk.f32.mxu1 %vm2242_vm1, %v2243_v1  ;;  %v579_v28 = vld [vmem:[%s2692_s4 + $0x18] sm:$0xff] }
 0x3a5   : > { %1973 = vmatprep.subr.mxu1 %v2243_v1 }
 0x3a7   : > { %1966 = vmatmul.mubr.msk.f32.vlgmr.msra.gmra.mrb[2].mxu1 %vm584_vm2, %v824_v32 }
 0x3a8   : > { %1975 = vmatprep.mubr.msk.f32.mxu1 %vm2242_vm1, %v2243_v1  ;;  %1974 = vmatpush3.msra.mxu1 %v577_v54  ;;  %v1583_v54 = vld [vmem:[%s2694_s6 + $0x18] sm:$0xff] }
 0x3a9   : > { %1983 = vmatprep.subr.mxu1 %v2243_v1 }
 0x476   : > { %v743_v33 = vpop.f32.mrb[0].mxu1 }
 0x477   : > { %v1957_v35 = vpop.f32.mrb[1].mxu1  ;;  %1961 = vmatmul.mubr.msk.f32.vlgmr.msra.gmra.mrb[4].mxu0 %vm584_vm2, %v743_v33 }
 0x478   : > { %1969 = vmatpush3.msra.mxu0 %v914_v34  ;;  %1970 = vmatprep.mubr.msk.f32.mxu0 %vm2242_vm1, %v2243_v1 }
 0x479   : > { %1978 = vmatprep.subr.mxu0 %v2243_v1 }
 0x47a   : > { %v897_v36 = vpop.f32.mrb[2].mxu1 }
 0x47b   : > { %v901_v37 = vmul.f32 0.35355338, %v897_v36  ;;  %v1967_v38 = vpop.f32.mrb[3].mxu1 }
 0x47d   : > { %v902_v39 = vsel %vm584_vm2, %v901_v37, -inf }
 0x47e   : > { %903 = vmax.xlane.f32.xlu1 %v902_v39 }
 0x50b   : > { %v904_v40 = vpop.xlane.xlu1 %903 }
 0x50c   : > { %v905_v41 = vsub.f32 %v901_v37, %v904_v40 }
 0x50e   : > { %v906_v42 = vmul.f32 1.442695, %v905_v41 }
 0x510   : > { %2126 = vpow2.f32 %v906_v42  ;;  %v1885_v42 = vld [vmem:[%s2693_s5] ss:$0 sm:$0xff] }
 0x51a   : > { %v2127_v43 = vpop.eup %2126 }
 0x51b   : > { %v908_v44 = vsel %vm584_vm2, %v2127_v43, 0.0 }
 0x51c   : > { %909 = vadd.xlane.f32.xlu0 %v908_v44 }
 0x532   : > { %1065 = vrot.lane.b32.xlu0 %v2492_v14, %s2250_s25 }
 0x54a   : > { %v817_v46 = vpop.f32.mrb[4].mxu0 }
 0x54b   : > { %v821_v47 = vadd.f32 %v817_v46, %v747_v45  ;;  %v1962_v48 = vpop.f32.mrb[5].mxu0 }
 0x54d   : > { %822 = vst.msk [vmem:[#allocation2] sm:$0xff] %vm502_vm0, %v821_v47 }
 0x554   : > { %v989_v5 = vld [vmem:[#allocation2] sm:$0xff] }
 0x5a9   : > { %v910_v50 = vpop.xlane.xlu0 %909 }
 0x5aa   : > { %2128 = vrcp.f32 %v910_v50 }
 0x5ad   : > { %v1066_v53 = vpop.permute.xlu0 %1065 }
 0x5b4   : > { %v2129_v51 = vpop.eup %2128 }
 0x5b5   : > { %v912_v52 = vmul.f32 %v2129_v51, %v2127_v43  ;;  %v1580_v51 = vld [vmem:[%s2694_s6] sm:$0xff] }
 0x5b7   : > { %1971 = vmatmul.mubr.msk.f32.vlgmr.msra.gmra.mrb[6].mxu0 %vm584_vm2, %v912_v52  ;;  %v1581_v52 = vld [vmem:[%s2694_s6 + $0x8] sm:$0xff] }
 0x5b8   : > { %1979 = vmatpush3.xpose.msk.msra.mxu0 %vm584_vm2, %v1068_v49  ;;  %1980 = vmatprep.mubr.msk.f32.mxu0 %vm2242_vm1, %v2243_v1 }
 0x5b9   : > { %1988 = vmatprep.subr.mxu0 %v2243_v1 }
 0x5bb   : > { %1981 = vmatmul.mubr.msk.f32.vlgmr.msra.gmra.mrb[8].mxu0 %vm584_vm2, %v1066_v53  ;;  %v2045_v53 = vpack.c.bf16 %v1581_v52, %v1580_v51 }
 0x5bc   : > { %1990 = vmatprep.mubr.msk.f32.mxu0 %vm2242_vm1, %v2243_v1  ;;  %1989 = vmatpush3.msra.mxu0 %v578_v16  ;;  %v1886_v16 = vld [vmem:[%s2695_s7] ss:$0 sm:$0xff] }
 0x5bd   : > { %1998 = vmatprep.subr.mxu0 %v2243_v1 }
 0x68a   : > { %v985_v55 = vpop.f32.mrb[6].mxu0 }
 0x68b   : > { %v1972_v56 = vpop.f32.mrb[7].mxu0  ;;  %1976 = vmatmul.mubr.msk.f32.vlgmr.msra.gmra.mrb[4].mxu1 %vm584_vm2, %v985_v55 }
 0x68c   : > { %1985 = vmatprep.mubr.msk.f32.mxu1 %vm2242_vm1, %v2243_v1  ;;  %v1665_v56 = vld [vmem:[%s2696_s8] sm:$0xff] }
 0x68e   : > { %v1139_v57 = vpop.f32.mrb[8].mxu0 }
 0x68f   : > { %v1143_v58 = vmul.f32 0.35355338, %v1139_v57  ;;  %v1982_v59 = vpop.f32.mrb[9].mxu0  ;;  %v1666_v57 = vld [vmem:[%s2696_s8 + $0x8] sm:$0xff] }
 0x690   : > { %v2051_v59 = vpack.c.bf16 %v1666_v57, %v1665_v56 }
 0x691   : > { %v1144_v60 = vsel %vm584_vm2, %v1143_v58, -inf }
 0x692   : > { %1145 = vmax.xlane.f32.xlu1 %v1144_v60  ;;  %v1668_v60 = vld [vmem:[%s2696_s8 + $0x18] sm:$0xff] }
 0x6a3   : > { %1155 = vrot.lane.b32.xlu1 %v2492_v14, %s2251_s18  ;;  %s1571_s18 = sld [smem:[#allocation3]] }
 0x6a7   : > { %1309 = vrot.lane.b32.xlu1 %v2492_v14, %s2252_s15  ;;  %s1577_s15 = sld [smem:[#allocation4]] }
 0x6ab   : > { %1307 = vrot.lane.b32.xlu1 %v2492_v14, %s2253_s27  ;;  %s1891_s27 = sshll.u32 %s2364_s11, 7  ;;  %s2255_s11 = smov [#allocation10]  }
 0x6ac   : > { %s2643_s25 = scalar_lea.hbm %s2701_s14, %s1891_s27  ;;  %s2176_s19 = sshll.u32 %s2255_s11, 4  ;;  %s2177_s19 = int_to_ptr.vmem [resolvable:$false] %s2176_s19 }
 0x6ad   : > { %p2179_p7 = scmp.lt.s32.totalorder %s2645_s26, %s2177_s19 }
 0x71f   : > { %v1146_v61 = vpop.xlane.xlu1 %1145 }
 0x720   : > { %v1147_v62 = vsub.f32 %v1143_v58, %v1146_v61  ;;  %v1667_v58 = vld [vmem:[%s2696_s8 + $0x10] sm:$0xff] }
 0x721   : > { %v2054_v61 = vpack.c.bf16 %v1668_v60, %v1667_v58 }
 0x722   : > { %v1148_v63 = vmul.f32 1.442695, %v1147_v62  ;;  %v1669_v62 = vld [vmem:[%s2696_s8 + $0x20] sm:$0xff] }
 0x723   : > { %v1156_v2 = vpop.permute.xlu1 %1155 }
 0x724   : > { %2130 = vpow2.f32 %v1148_v63  ;;  %1984 = vmatpush3.msra.mxu1 %v1156_v2  ;;  %v1670_v63 = vld [vmem:[%s2696_s8 + $0x28] sm:$0xff] }
 0x725   : > { %1993 = vmatprep.subr.mxu1 %v2243_v1  ;;  %v2057_v2 = vpack.c.bf16 %v1670_v63, %v1669_v62 }
 0x727   : > { %v1310_v12 = vpop.permute.xlu1 %1309 }
 0x72b   : > { %v1308_v15 = vpop.permute.xlu1 %1307 }
 0x72e   : > { %v2131_v3 = vpop.eup %2130 }
 0x72f   : > { %v1150_v4 = vsel %vm584_vm2, %v2131_v3, 0.0 }
 0x730   : > { %1151 = vadd.xlane.f32.xlu0 %v1150_v4 }
 0x75e   : > { %v1059_v6 = vpop.f32.mrb[4].mxu1 }
 0x75f   : > { %v1063_v7 = vadd.f32 %v1059_v6, %v989_v5  ;;  %v1977_v8 = vpop.f32.mrb[5].mxu1  ;;  %v1572_v6 = vstv %s1571_s18  ;;  %s1765_s18 = sld [smem:[#allocation5]] }
 0x761   : > { %1064 = vst.msk [vmem:[#allocation2] sm:$0xff] %vm502_vm0, %v1063_v7 }
 0x768   : > { %v1231_v29 = vld [vmem:[#allocation2] sm:$0xff] }
 0x7bd   : > { %v1152_v9 = vpop.xlane.xlu0 %1151 }
 0x7be   : > { %2132 = vrcp.f32 %v1152_v9  ;;  %v1578_v9 = vstv %s1577_s15  ;;  %s1771_s15 = sld [smem:[#allocation6]] }
 0x7c8   : > { %v2133_v10 = vpop.eup %2132 }
 0x7c9   : > { %v1154_v13 = vmul.f32 %v2133_v10, %v2131_v3 }
 0x7cb   : > { %1986 = vmatmul.mubr.msk.f32.vlgmr.msra.gmra.mrb[6].mxu1 %vm584_vm2, %v1154_v13  ;;  %v1671_v13 = vld [vmem:[%s2696_s8 + $0x30] sm:$0xff] }
 0x7cc   : > { %1994 = vmatpush3.xpose.msk.msra.mxu1 %vm584_vm2, %v1310_v12  ;;  %1995 = vmatprep.mubr.msk.f32.mxu1 %vm2242_vm1, %v2243_v1 }
 0x7cd   : > { %2003 = vmatprep.subr.mxu1 %v2243_v1 }
 0x7cf   : > { %1996 = vmatmul.mubr.msk.f32.vlgmr.msra.gmra.mrb[8].mxu1 %vm584_vm2, %v1308_v15 }
 0x7d0   : > { %2005 = vmatprep.mubr.msk.f32.mxu1 %vm2242_vm1, %v2243_v1  ;;  %2004 = vmatpush3.msra.mxu1 %v579_v28 }
 0x7d1   : > { %2050 = vmatprep.subr.bf16.mxu1 %v2241_v0 }
 0x89e   : > { %v1227_v17 = vpop.f32.mrb[6].mxu1 }
 0x89f   : > { %v1987_v18 = vpop.f32.mrb[7].mxu1  ;;  %1991 = vmatmul.mubr.msk.f32.vlgmr.msra.gmra.mrb[10].mxu0 %vm584_vm2, %v1227_v17 }
 0x8a0   : > { %2000 = vmatprep.mubr.msk.f32.mxu0 %vm2242_vm1, %v2243_v1 }
 0x8a2   : > { %v1381_v19 = vpop.f32.mrb[8].mxu1 }
 0x8a3   : > { %v1385_v20 = vmul.f32 0.35355338, %v1381_v19  ;;  %v1997_v21 = vpop.f32.mrb[9].mxu1 }
 0x8a4   : > { %v1888_v21 = vld [vmem:[%s2697_s9] ss:$0 sm:$0xff] }
 0x8a5   : > { %v1386_v22 = vsel %vm584_vm2, %v1385_v20, -inf }
 0x8a6   : > { %1387 = vmax.xlane.f32.xlu1 %v1386_v22 }
 0x933   : > { %v1388_v23 = vpop.xlane.xlu1 %1387 }
 0x934   : > { %v1389_v24 = vsub.f32 %v1385_v20, %v1388_v23 }
 0x936   : > { %v1390_v25 = vmul.f32 1.442695, %v1389_v24 }
 0x938   : > { %2134 = vpow2.f32 %v1390_v25 }
 0x942   : > { %v2135_v26 = vpop.eup %2134 }
 0x943   : > { %v1392_v27 = vsel %vm584_vm2, %v2135_v26, 0.0 }
 0x944   : > { %1393 = vadd.xlane.f32.xlu0 %v1392_v27 }
 0x95a   : > { %1397 = vrot.lane.b32.xlu0 %v2492_v14, %s2254_s12 }
 0x972   : > { %v1301_v30 = vpop.f32.mrb[10].mxu0 }
 0x973   : > { %v1305_v31 = vadd.f32 %v1301_v30, %v1231_v29  ;;  %v1992_v32 = vpop.f32.mrb[11].mxu0 }
 0x975   : > { %1306 = vst.msk [vmem:[#allocation2] sm:$0xff] %vm502_vm0, %v1305_v31 }
 0x97c   : > { %v1473_v38 = vld [vmem:[#allocation2] sm:$0xff] }
 0x9d1   : > { %v1394_v33 = vpop.xlane.xlu0 %1393 }
 0x9d2   : > { %2136 = vrcp.f32 %v1394_v33 }
 0x9d5   : > { %v1398_v34 = vpop.permute.xlu0 %1397 }
 0x9d6   : > { %1999 = vmatpush3.msra.mxu0 %v1398_v34 }
 0x9d7   : > { %2044 = vmatprep.subr.bf16.mxu0 %v2241_v0 }
 0x9dc   : > { %v2137_v14 = vpop.eup %2136 }
 0x9dd   : > { %v1396_v35 = vmul.f32 %v2137_v14, %v2135_v26  ;;  %v1766_v14 = vstv %s1765_s18  ;;  %s2178_s18 = scalar_lea.vmem %s2177_s19, 256 }
 0x9de   : > { %p2180_p10 = scmp.lt.s32.totalorder %s2178_s18, %s2172_s24 }
 0x9df   : > { %2001 = vmatmul.mubr.msk.f32.vlgmr.msra.gmra.mrb[12].mxu0 %vm584_vm2, %v1396_v35 }
 0x9e0   : > { %2016 = vmatprep.mubr.msk.f32.mxu0 %vm2242_vm1, %v2243_v1  ;;  %2046 = vmatpush3.bf16.msra.mxu0 %v2045_v53  ;;  %p2181_p2 = por %p2180_p10, %p2179_p7 }
 0x9e1   : > { %2047 = vmatprep.subr.bf16.mxu0 %v2241_v0 }
 0x9e2   : > { %p2182_p4 = pnand %p2181_p2, %p2175_p13 }
 0xab2   : > { %v1469_v36 = vpop.f32.mrb[12].mxu0 }
 0xab3   : > { %v2002_v37 = vpop.f32.mrb[13].mxu0  ;;  %2006 = vmatmul.mubr.msk.f32.vlgmr.msra.gmra.mrb[10].mxu1 %vm584_vm2, %v1469_v36 }
 0xab4   : > { %2035 = vmatprep.mubr.msk.f32.mxu1 %vm2242_vm1, %v2243_v1  ;;  %2052 = vmatpush3.bf16.msra.mxu1 %v2051_v59  ;;  %v1772_v37 = vstv %s1771_s15 }
 0xab5   : > { %2053 = vmatprep.subr.bf16.mxu1 %v2241_v0 }
 0xab8   : > { %2055 = vmatpush3.bf16.msra.mxu1 %v2054_v61 }
 0xab9   : > { %2056 = vmatprep.subr.bf16.mxu1 %v2241_v0 }
 0xabc   : > { %2058 = vmatpush3.bf16.msra.mxu1 %v2057_v2 }
 0xabd   : > { %2059 = vmatprep.subr.bf16.mxu1 %v2241_v0  ;;  %v1672_v0 = vld [vmem:[%s2696_s8 + $0x38] sm:$0xff] }
 0xabe   : > { %v2060_v15 = vpack.c.bf16 %v1672_v0, %v1671_v13 }
 0xac0   : > { %2061 = vmatpush3.bf16.msra.mxu1 %v2060_v15 }
 0xb86   : > { %v1543_v39 = vpop.f32.mrb[10].mxu1 }
 0xb87   : > { %v1547_v40 = vadd.f32 %v1543_v39, %v1473_v38  ;;  %v2007_v41 = vpop.f32.mrb[11].mxu1 }
 0xb89   : > { %1548 = vst.msk [vmem:[#allocation2] sm:$0xff] %vm502_vm0, %v1547_v40 }
 0xb90   : > { %v1549_v43 = vld [vmem:[#allocation2] sm:$0xff] }
 0xb91   : > { %v1557_v44 = vadd.f32 %v1885_v42, %v1549_v43 }
 0xb93   : > { %v1558_v45 = vadd.f32 %v1557_v44, %v2482_v11  ;;  %v1582_v11 = vld [vmem:[%s2694_s6 + $0x10] sm:$0xff] }
 0xb94   : > { %v2048_v55 = vpack.c.bf16 %v1583_v54, %v1582_v11 }
 0xb95   : > { %v1559_v46 = vsel %vm502_vm0, %v1558_v45, 0.0 }
 0xb96   : > { %1560 = vadd.xlane.f32.xlu0 %v1559_v46  ;;  %2049 = vmatpush3.bf16.msra.mxu0 %v2048_v55 }
 0xc23   : > { %v1561_v47 = vpop.xlane.xlu0 %1560 }
 0xc24   : > { %v1563_v48 = vmul.f32 0.03125, %v1561_v47 }
 0xc26   : > { %v1564_v1 = vsub.f32 %v1558_v45, %v1563_v48 }
 0xc28   : > { %v1565_v49 = vmul.f32 %v1564_v1, %v1564_v1  ;;  %v1573_v7 = vmul.f32 %v1572_v6, %v1564_v1 }
 0xc2a   : > { %v1566_v50 = vsel %vm502_vm0, %v1565_v49, 0.0 }
 0xc2b   : > { %1567 = vadd.xlane.f32.xlu1 %v1566_v50 }
 0xcb8   : > { %v1568_v3 = vpop.xlane.xlu1 %1567 }
 0xcb9   : > { %v1570_v4 = vmul.f32 0.032258064, %v1568_v3 }
 0xcbb   : > { %v1574_v5 = vadd.f32 1e-06, %v1570_v4 }
 0xcbd   : > { %2138 = vrsqrt.f32 %v1574_v5 }
 0xcc7   : > { %v2139_v8 = vpop.eup %2138 }
 0xcc8   : > { %v1576_v10 = vmul.f32 %v2139_v8, %v1573_v7 }
 0xcca   : > { %v1579_v12 = vadd.f32 %v1578_v9, %v1576_v10 }
 0xccc   : > { %2017 = vmatmul.mubr.msk.f32.vlgmr.msra.gmra.mrb[14].mxu0 %vm502_vm0, %v1579_v12 }
 0xd9f   : > { %v1660_v17 = vpop.f32.mrb[14].mxu0 }
 0xda0   : > { %v1661_v18 = vadd.f32 %v1886_v16, %v1660_v17  ;;  %v2018_v19 = vpop.f32.mrb[15].mxu0 }
 0xda2   : > { %v1664_v20 = vmax.f32 %v1661_v18, 0.0 }
 0xda4   : > { %2036 = vmatmul.mubr.msk.f32.vlgmr.msra.gmra.mrb[12].mxu1 %vm1680_vm3, %v1664_v20 }
 0xe77   : > { %v1750_v22 = vpop.f32.mrb[12].mxu1 }
 0xe78   : > { %v1751_v23 = vadd.f32 %v1888_v21, %v1750_v22  ;;  %v2037_v24 = vpop.f32.mrb[13].mxu1 }
 0xe7a   : > { %v1754_v25 = vadd.f32 %v1751_v23, %v1579_v12 }
 0xe7c   : > { %v1755_v26 = vsel %vm502_vm0, %v1754_v25, 0.0 }
 0xe7d   : > { %1756 = vadd.xlane.f32.xlu1 %v1755_v26 }
 0xf0a   : > { %v1757_v27 = vpop.xlane.xlu1 %1756 }
 0xf0b   : > { %v1758_v28 = vmul.f32 0.03125, %v1757_v27 }
 0xf0d   : > { %v1759_v29 = vsub.f32 %v1754_v25, %v1758_v28 }
 0xf0f   : > { %v1760_v30 = vmul.f32 %v1759_v29, %v1759_v29  ;;  %v1767_v35 = vmul.f32 %v1766_v14, %v1759_v29 }
 0xf11   : > { %v1761_v31 = vsel %vm502_vm0, %v1760_v30, 0.0 }
 0xf12   : > { %1762 = vadd.xlane.f32.xlu1 %v1761_v31 }
 0xf9f   : > { %v1763_v32 = vpop.xlane.xlu1 %1762 }
 0xfa0   : > { %v1764_v33 = vmul.f32 0.032258064, %v1763_v32 }
 0xfa2   : > { %v1768_v34 = vadd.f32 1e-06, %v1764_v33 }
 0xfa4   : > { %2140 = vrsqrt.f32 %v1768_v34 }
 0xfae   : > { %v2141_v36 = vpop.eup %2140 }
 0xfaf   : > { %v1770_v38 = vmul.f32 %v2141_v36, %v1767_v35 }
 0xfb1   : > { %v1773_v39 = vadd.f32 %v1772_v37, %v1770_v38 }
 0xfb3   : > { %1774 = vst.msk [vmem:[%s486_s17] sm:$0xff] %vm502_vm0, %v1773_v39 }
 0xfb4   : > { %2185 = shalt.err (!%p2182_p4)
}
 0xfb5   : > { %s2186_s16 = scalar_lea.hbm %s2643_s25, 128  ;;  %s2190_s17 = scalar_lea.hbm %s2701_s14, 256 }
 0xfb6   : > { %p2187_p5 = scmp.ne.s32.totalorder %s2643_s25, %s2186_s16  ;;  %p2191_p0 = scmp.lt.u32.totalorder %s2643_s25, %s2701_s14 }
 0xfb7   : > { %p2192_p1 = scmp.lt.u32.totalorder %s2190_s17, %s2186_s16  ;;  %p2194_p6 = scmp.lt.u32.totalorder %s2186_s16, %s2643_s25 }
 0xfb8   : > { %p2188_p8 = pnand %p2187_p5, %p2712_p11 }
 0xfb9   : > { %p2193_p3 = por %p2192_p1, %p2191_p0 }
 0xfba   : > { %p2189_p9 = pneg %p2188_p8 }
 0xfbb   : > { %p2195_p12 = por %p2194_p6, %p2193_p3 }
 0xfbd   : > { %p2196_p13 = pnand %p2195_p12, %p2189_p9 }
 0xfbf   : > { %2199 = shalt.err (!%p2196_p13)
}
 0xfc0   : > { %2064 = dma.vmem_to_hbm [thread:$0]  (%p2712_p11), %s2645_s26, 128, %s2643_s25, %s1776_s28  }
 0xfc1 PF: > { %s1801_s24 = sand.u32 1, %s2226_s21   ;;  %p2713_p7 = scmp.ne.s32.totalorder %s2708_s30, 0 }
 0xfc2   : > { %p2714_p10 = scmp.ge.s32.totalorder %s2238_s23, 2  ;;  %s1802_s11 = scalar_lea.sflag [#allocation9], %s1801_s24 }
 0xfc4   : > { %p2071_p2 = pnand %p2714_p10, %p2713_p7 }
 0xfc6   : > { %2221 = dma.done.wait (!%p2071_p2), %s1802_s11, 128  }
 0xfc7   : > { %2223 = vsyncadd (!%p2071_p2), %s1802_s11, 4294967168  ;;  %s2715_s19 = sld [smem:[#allocation13_spill]]  ;;  %p31_p4 = scmp.ge.s32.totalorder %s2368_s13, 4  }
 0xfc8   : > { %s2716_s21 = smov %s2230_s22  ;;  %s2717_s22 = smov %s2234_s10 }
 0xfc9   : > { %s2719_s23 = smov %s2368_s13  ;;  %33 = sbr.rel (!%p31_p4) target bundleno = 10 (0xa), region = 121 }
 0xfcd   : > { %s2718_s10 = smov %s2715_s19 }
 0xfd0   :  { %1807 = vsyncpa [#allocation8], 1 }
 0xfd1   :  { %1809 = vsyncpa [#allocation8 + $0x1], 1 }
 0xfd2   :  { %1810 = vsyncpa [#allocation9], 1 }
 0xfd3   :  { %1812 = vsyncpa [#allocation9 + $0x1], 1 }

</bundles_post_ra>
